<compile_context>
chip_gen: v5e
topology: v5e:2x2
jax: 0.10.0
libtpu: 0.0.40
codegen_flags: <defaults>
</compile_context>

<pallas_src>
import functools

import jax
import jax.numpy as jnp
from jax.experimental import pallas as pl
from jax.experimental.pallas import tpu as pltpu


def _residual_kernel(x_ref, alpha_ref, beta_ref, w_ref, b_ref, o_ref, *, eps):
    # x tile: (TM, F); alpha/beta/b: (1, F); w: (F, F) resident in VMEM.
    x = x_ref[...].astype(jnp.float32)
    f = x.shape[-1]

    # LayerNormalization, matching the PyTorch module:
    #   std = x.std(dim=-1)  (unbiased, ddof=1);  out = alpha*(x-mean)/(std+eps)+bias
    mean = jnp.mean(x, axis=-1, keepdims=True)
    d = x - mean
    var = jnp.sum(d * d, axis=-1, keepdims=True) * (1.0 / max(f - 1, 1))
    std = jnp.sqrt(var)
    inv = pl.reciprocal(std + eps, approx=False)  # exact: only TM values per tile
    normed = alpha_ref[...].astype(jnp.float32) * (d * inv) \
        + beta_ref[...].astype(jnp.float32)

    # sublayer = Linear(F, F): bf16 operands on the MXU, f32 accumulation.
    y = jnp.dot(normed.astype(w_ref.dtype), w_ref[...],
                preferred_element_type=jnp.float32)
    y = y + b_ref[...].astype(jnp.float32)

    # dropout (eval/inference mode) is identity; residual add in f32.
    # TODO(synk): training-mode dropout (stochastic mask via pltpu.prng_*) not implemented.
    o_ref[...] = (x + y).astype(o_ref.dtype)


def _round_up(n, m):
    return ((n + m - 1) // m) * m


def residual_connection(x, alpha, beta, w, b, *, eps=1e-6, tile_rows=1024):
    """x: (B, S, F). alpha/beta/b: (F,). w: (F, F). Returns (B, S, F)."""
    B, S, F = x.shape
    rows = B * S
    x2 = x.reshape(rows, F)

    itm = jnp.dtype(x.dtype).itemsize
    sub = max(8, 32 // itm)  # sublane multiple: 8 (f32), 16 (bf16), 32 (int8)

    # Large row tile, but clamped so the "parallel" grid axis has >= 2 steps
    # (megacore sharding on v7x needs at least one step per TensorCore).
    tm = max(sub, min(tile_rows, _round_up(pl.cdiv(rows, 2), sub)))
    grid = pl.cdiv(rows, tm)  # partial last block handled by Pallas masking

    # One-time bf16 cast of the matmul weight (native MXU dtype on all gens).
    w_k = w.astype(jnp.bfloat16)
    alpha2 = alpha.reshape(1, F)
    beta2 = beta.reshape(1, F)
    b2 = b.reshape(1, F).astype(jnp.float32)

    # VMEM budget: double-buffered x/out tiles + weight + small param vectors.
    w_bytes = F * F * jnp.dtype(w_k.dtype).itemsize
    est = (4 * tm * F * itm        # 2x x-tile + 2x out-tile (double buffered)
           + 2 * w_bytes           # weight (worst case: default double buffer)
           + 8 * F * 4)            # alpha/beta/bias
    try:
        vmem_cap = int(pltpu.get_tpu_info().vmem_capacity_bytes)
    except Exception:  # pragma: no cover - conservative fallback (v7x physical)
        vmem_cap = 64 * 1024 * 1024
    headroom = 12 * 1024 * 1024    # Mosaic internal scratch etc.
    vmem_limit = int(min(vmem_cap - headroom,
                         max(est + (4 << 20), 32 * 1024 * 1024)))
    # TODO(synk): for very large F (FxF weight approaching the VMEM budget), add a
    # second grid dim over the weight's output-feature axis instead of keeping it
    # fully resident.

    cost = pl.CostEstimate(
        flops=2 * rows * F * F,
        transcendentals=rows,  # one sqrt / reciprocal pair per row
        bytes_accessed=2 * rows * F * itm + w_bytes + 3 * F * 4)

    kernel = functools.partial(_residual_kernel, eps=eps)

    def _pcall(w_spec):
        return pl.pallas_call(
            kernel,
            out_shape=jax.ShapeDtypeStruct((rows, F), x.dtype),
            grid_spec=pltpu.PrefetchScalarGridSpec(
                num_scalar_prefetch=0,
                grid=(grid,),
                in_specs=[
                    pl.BlockSpec((tm, F), lambda i: (i, 0)),   # x tile
                    pl.BlockSpec((1, F), lambda i: (0, 0)),    # alpha (invariant)
                    pl.BlockSpec((1, F), lambda i: (0, 0)),    # beta  (invariant)
                    w_spec,                                    # weight (invariant)
                    pl.BlockSpec((1, F), lambda i: (0, 0)),    # bias  (invariant)
                ],
                out_specs=pl.BlockSpec((tm, F), lambda i: (i, 0)),
            ),
            compiler_params=pltpu.CompilerParams(
                dimension_semantics=("parallel",),  # shard across TCs (v7x megacore)
                vmem_limit_bytes=vmem_limit),
            cost_estimate=cost,
        )(x2, alpha2, beta2, w_k, b2)

    try:
        # Grid-invariant weight only needs a single VMEM buffer (it is DMA'd once).
        out2 = _pcall(pl.BlockSpec((F, F), lambda i: (0, 0),
                                   pipeline_mode=pl.Buffered(1)))
    except Exception:
        # Fallback for Pallas versions that reject single-buffered pipeline_mode.
        out2 = _pcall(pl.BlockSpec((F, F), lambda i: (0, 0)))

    return out2.reshape(B, S, F)


def _reference(x, alpha, beta, w, b, eps=1e-6):
    F = x.shape[-1]
    mean = jnp.mean(x, axis=-1, keepdims=True)
    d = x - mean
    std = jnp.sqrt(jnp.sum(d * d, axis=-1, keepdims=True) / (F - 1))
    normed = alpha * d / (std + eps) + beta
    return x + (jnp.einsum("bsf,fg->bsg", normed, w) + b)


if __name__ == "__main__":
    key = jax.random.PRNGKey(0)
    kx, kw, kb, kx2 = jax.random.split(key, 4)

    # F = 128 keeps output stores lane-dense (full 128-lane vregs).
    B, S, F = 2, 8, 128
    x = jax.random.normal(kx, (B, S, F), dtype=jnp.float32)

    # LayerNormalization params: alpha = ones, bias = zeros (as in __init__)
    alpha = jnp.ones((F,), dtype=jnp.float32)
    beta = jnp.zeros((F,), dtype=jnp.float32)

    # Deterministic sublayer (Linear F->F) params
    w = jax.random.normal(kw, (F, F), dtype=jnp.float32) * 0.05
    b = jax.random.normal(kb, (F,), dtype=jnp.float32) * 0.05

    out = residual_connection(x, alpha, beta, w, b)
    jax.block_until_ready(out)
    ref = _reference(x, alpha, beta, w, b)
    # Tolerance covers the bf16 MXU path (weights/activations rounded to bf16 for
    # the matmul); LN itself is exact f32.
    assert jnp.allclose(out, ref, atol=2e-2, rtol=2e-2), \
        float(jnp.max(jnp.abs(out - ref)))

    # Second check: B*S not a multiple of the row tile -> exercises the masked
    # partial last block (600 rows -> tm=304 -> grid of 2, last block ragged).
    B2, S2 = 2, 300
    x_b = jax.random.normal(kx2, (B2, S2, F), dtype=jnp.float32)
    out_b = residual_connection(x_b, alpha, beta, w, b)
    jax.block_until_ready(out_b)
    ref_b = _reference(x_b, alpha, beta, w, b)
    assert jnp.allclose(out_b, ref_b, atol=2e-2, rtol=2e-2), \
        float(jnp.max(jnp.abs(out_b - ref_b)))

    print("KERNEL_OK")
</pallas_src>

<mosaic_0001>
module attributes {stable_mosaic.version = 11 : i64} {
  func.func @_residual_kernel(%arg0: i32, %arg1: memref<8x128xf32, #tpu.memory_space<vmem>>, %arg2: memref<1x128xf32, #tpu.memory_space<vmem>>, %arg3: memref<1x128xf32, #tpu.memory_space<vmem>>, %arg4: memref<128x128xbf16, #tpu.memory_space<vmem>>, %arg5: memref<1x128xf32, #tpu.memory_space<vmem>>, %arg6: memref<8x128xf32, #tpu.memory_space<vmem>>) attributes {dimension_semantics = [#tpu.dimension_semantics<parallel>], iteration_bounds = array<i64: 2>, scalar_prefetch = 0 : i64, scratch_operands = 0 : i64, tpu.core_type = #tpu.core_type<tc>, window_params = [{transform_indices = @transform_0, window_bounds = array<i64: 8, 128>}, {pipeline_mode = #tpu.pipeline_mode<synchronous>, transform_indices = @transform_1, window_bounds = array<i64: 1, 128>}, {pipeline_mode = #tpu.pipeline_mode<synchronous>, transform_indices = @transform_2, window_bounds = array<i64: 1, 128>}, {pipeline_mode = #tpu.pipeline_mode<synchronous>, transform_indices = @transform_3, window_bounds = array<i64: 128, 128>}, {pipeline_mode = #tpu.pipeline_mode<synchronous>, transform_indices = @transform_4, window_bounds = array<i64: 1, 128>}, {transform_indices = @transform_5, window_bounds = array<i64: 8, 128>}]} {
    %c0 = arith.constant 0 : index
    %c0_0 = arith.constant 0 : index
    %0 = vector.load %arg1[%c0, %c0_0] : memref<8x128xf32, #tpu.memory_space<vmem>>, vector<8x128xf32>
    %cst = arith.constant dense<0.000000e+00> : vector<8xf32>
    %1 = vector.multi_reduction <add>, %0, %cst [1] : vector<8x128xf32> to vector<8xf32>
    %2 = vector.shape_cast %1 : vector<8xf32> to vector<8x1xf32>
    %cst_1 = arith.constant 1.280000e+02 : f32
    %3 = vector.broadcast %cst_1 : f32 to vector<8x1xf32>
    %4 = arith.divf %2, %3 : vector<8x1xf32>
    %5 = vector.broadcast %4 : vector<8x1xf32> to vector<8x128xf32>
    %6 = arith.subf %0, %5 : vector<8x128xf32>
    %7 = arith.mulf %6, %6 : vector<8x128xf32>
    %cst_2 = arith.constant dense<0.000000e+00> : vector<8xf32>
    %8 = vector.multi_reduction <add>, %7, %cst_2 [1] : vector<8x128xf32> to vector<8xf32>
    %9 = vector.shape_cast %8 : vector<8xf32> to vector<8x1xf32>
    %cst_3 = arith.constant 0.00787401571 : f32
    %10 = vector.broadcast %cst_3 : f32 to vector<8x1xf32>
    %11 = arith.mulf %9, %10 : vector<8x1xf32>
    %12 = math.sqrt %11 : vector<8x1xf32>
    %cst_4 = arith.constant 9.99999997E-7 : f32
    %13 = vector.broadcast %cst_4 : f32 to vector<8x1xf32>
    %14 = arith.addf %12, %13 : vector<8x1xf32>
    %15 = tpu.reciprocal %14 : vector<8x1xf32> -> vector<8x1xf32>
    %c0_5 = arith.constant 0 : index
    %c0_6 = arith.constant 0 : index
    %16 = vector.load %arg2[%c0_5, %c0_6] : memref<1x128xf32, #tpu.memory_space<vmem>>, vector<1x128xf32>
    %17 = vector.broadcast %15 : vector<8x1xf32> to vector<8x128xf32>
    %18 = arith.mulf %6, %17 : vector<8x128xf32>
    %19 = vector.broadcast %16 : vector<1x128xf32> to vector<8x128xf32>
    %20 = arith.mulf %19, %18 : vector<8x128xf32>
    %c0_7 = arith.constant 0 : index
    %c0_8 = arith.constant 0 : index
    %21 = vector.load %arg3[%c0_7, %c0_8] : memref<1x128xf32, #tpu.memory_space<vmem>>, vector<1x128xf32>
    %22 = vector.broadcast %21 : vector<1x128xf32> to vector<8x128xf32>
    %23 = arith.addf %20, %22 : vector<8x128xf32>
    %24 = arith.truncf %23 : vector<8x128xf32> to vector<8x128xbf16>
    %c0_9 = arith.constant 0 : index
    %c0_10 = arith.constant 0 : index
    %25 = vector.load %arg4[%c0_9, %c0_10] : memref<128x128xbf16, #tpu.memory_space<vmem>>, vector<128x128xbf16>
    %cst_11 = arith.constant dense<0.000000e+00> : vector<8x128xf32>
    %26 = tpu.matmul %24, %25, %cst_11 {dimension_numbers = #tpu.dot_dimension_numbers<[1], [0], [0], [1], [0, 0, 1, 1], [], []>} : vector<8x128xbf16>, vector<128x128xbf16>, vector<8x128xf32> -> vector<8x128xf32>
    %c0_12 = arith.constant 0 : index
    %c0_13 = arith.constant 0 : index
    %27 = vector.load %arg5[%c0_12, %c0_13] : memref<1x128xf32, #tpu.memory_space<vmem>>, vector<1x128xf32>
    %28 = vector.broadcast %27 : vector<1x128xf32> to vector<8x128xf32>
    %29 = arith.addf %26, %28 : vector<8x128xf32>
    %30 = arith.addf %0, %29 : vector<8x128xf32>
    %c0_14 = arith.constant 0 : index
    %c0_15 = arith.constant 0 : index
    %31 = vector.load %arg6[%c0_14, %c0_15] : memref<8x128xf32, #tpu.memory_space<vmem>>, vector<8x128xf32>
    tpu.vector_store %arg6[%c0_14, %c0_15], %30 {strides = array<i32>} : memref<8x128xf32, #tpu.memory_space<vmem>>, vector<8x128xf32>,
    return
  }
  func.func @transform_0(%arg0: i32) -> (i32, i32) {
    %c0_i32 = arith.constant 0 : i32
    %c0_i32_0 = arith.constant 0 : i32
    return %arg0, %c0_i32 : i32, i32
  }
  func.func @transform_1(%arg0: i32) -> (i32, i32) {
    %c0_i32 = arith.constant 0 : i32
    %c0_i32_0 = arith.constant 0 : i32
    %c0_i32_1 = arith.constant 0 : i32
    return %c0_i32, %c0_i32_0 : i32, i32
  }
  func.func @transform_2(%arg0: i32) -> (i32, i32) {
    %c0_i32 = arith.constant 0 : i32
    %c0_i32_0 = arith.constant 0 : i32
    %c0_i32_1 = arith.constant 0 : i32
    return %c0_i32, %c0_i32_0 : i32, i32
  }
  func.func @transform_3(%arg0: i32) -> (i32, i32) {
    %c0_i32 = arith.constant 0 : i32
    %c0_i32_0 = arith.constant 0 : i32
    %c0_i32_1 = arith.constant 0 : i32
    return %c0_i32, %c0_i32_0 : i32, i32
  }
  func.func @transform_4(%arg0: i32) -> (i32, i32) {
    %c0_i32 = arith.constant 0 : i32
    %c0_i32_0 = arith.constant 0 : i32
    %c0_i32_1 = arith.constant 0 : i32
    return %c0_i32, %c0_i32_0 : i32, i32
  }
  func.func @transform_5(%arg0: i32) -> (i32, i32) {
    %c0_i32 = arith.constant 0 : i32
    %c0_i32_0 = arith.constant 0 : i32
    return %arg0, %c0_i32 : i32, i32
  }
}

module attributes {stable_mosaic.version = 11 : i64} {
  func.func @_residual_kernel(%arg0: i32, %arg1: memref<8x128xf32, #tpu.memory_space<vmem>>, %arg2: memref<1x128xf32, #tpu.memory_space<vmem>>, %arg3: memref<1x128xf32, #tpu.memory_space<vmem>>, %arg4: memref<128x128xbf16, #tpu.memory_space<vmem>>, %arg5: memref<1x128xf32, #tpu.memory_space<vmem>>, %arg6: memref<8x128xf32, #tpu.memory_space<vmem>>) attributes {dimension_semantics = [#tpu.dimension_semantics<parallel>], iteration_bounds = array<i64: 2>, scalar_prefetch = 0 : i64, scratch_operands = 0 : i64, tpu.core_type = #tpu.core_type<tc>, window_params = [{transform_indices = @transform_0, window_bounds = array<i64: 8, 128>}, {pipeline_mode = #tpu.pipeline_mode<synchronous>, transform_indices = @transform_1, window_bounds = array<i64: 1, 128>}, {pipeline_mode = #tpu.pipeline_mode<synchronous>, transform_indices = @transform_2, window_bounds = array<i64: 1, 128>}, {pipeline_mode = #tpu.pipeline_mode<synchronous>, transform_indices = @transform_3, window_bounds = array<i64: 128, 128>}, {pipeline_mode = #tpu.pipeline_mode<synchronous>, transform_indices = @transform_4, window_bounds = array<i64: 1, 128>}, {transform_indices = @transform_5, window_bounds = array<i64: 8, 128>}]} {
    %c0 = arith.constant 0 : index
    %c0_0 = arith.constant 0 : index
    %0 = vector.load %arg1[%c0, %c0_0] : memref<8x128xf32, #tpu.memory_space<vmem>>, vector<8x128xf32>
    %cst = arith.constant dense<0.000000e+00> : vector<8xf32>
    %1 = vector.multi_reduction <add>, %0, %cst [1] : vector<8x128xf32> to vector<8xf32>
    %2 = vector.shape_cast %1 : vector<8xf32> to vector<8x1xf32>
    %cst_1 = arith.constant 1.280000e+02 : f32
    %3 = vector.broadcast %cst_1 : f32 to vector<8x1xf32>
    %4 = arith.divf %2, %3 : vector<8x1xf32>
    %5 = vector.broadcast %4 : vector<8x1xf32> to vector<8x128xf32>
    %6 = arith.subf %0, %5 : vector<8x128xf32>
    %7 = arith.mulf %6, %6 : vector<8x128xf32>
    %cst_2 = arith.constant dense<0.000000e+00> : vector<8xf32>
    %8 = vector.multi_reduction <add>, %7, %cst_2 [1] : vector<8x128xf32> to vector<8xf32>
    %9 = vector.shape_cast %8 : vector<8xf32> to vector<8x1xf32>
    %cst_3 = arith.constant 0.00787401571 : f32
    %10 = vector.broadcast %cst_3 : f32 to vector<8x1xf32>
    %11 = arith.mulf %9, %10 : vector<8x1xf32>
    %12 = math.sqrt %11 : vector<8x1xf32>
    %cst_4 = arith.constant 9.99999997E-7 : f32
    %13 = vector.broadcast %cst_4 : f32 to vector<8x1xf32>
    %14 = arith.addf %12, %13 : vector<8x1xf32>
    %15 = tpu.reciprocal %14 : vector<8x1xf32> -> vector<8x1xf32>
    %c0_5 = arith.constant 0 : index
    %c0_6 = arith.constant 0 : index
    %16 = vector.load %arg2[%c0_5, %c0_6] : memref<1x128xf32, #tpu.memory_space<vmem>>, vector<1x128xf32>
    %17 = vector.broadcast %15 : vector<8x1xf32> to vector<8x128xf32>
    %18 = arith.mulf %6, %17 : vector<8x128xf32>
    %19 = vector.broadcast %16 : vector<1x128xf32> to vector<8x128xf32>
    %20 = arith.mulf %19, %18 : vector<8x128xf32>
    %c0_7 = arith.constant 0 : index
    %c0_8 = arith.constant 0 : index
    %21 = vector.load %arg3[%c0_7, %c0_8] : memref<1x128xf32, #tpu.memory_space<vmem>>, vector<1x128xf32>
    %22 = vector.broadcast %21 : vector<1x128xf32> to vector<8x128xf32>
    %23 = arith.addf %20, %22 : vector<8x128xf32>
    %24 = arith.truncf %23 : vector<8x128xf32> to vector<8x128xbf16>
    %c0_9 = arith.constant 0 : index
    %c0_10 = arith.constant 0 : index
    %25 = vector.load %arg4[%c0_9, %c0_10] : memref<128x128xbf16, #tpu.memory_space<vmem>>, vector<128x128xbf16>
    %cst_11 = arith.constant dense<0.000000e+00> : vector<8x128xf32>
    %26 = tpu.matmul %24, %25, %cst_11 {dimension_numbers = #tpu.dot_dimension_numbers<[1], [0], [0], [1], [0, 0, 1, 1], [], []>} : vector<8x128xbf16>, vector<128x128xbf16>, vector<8x128xf32> -> vector<8x128xf32>
    %c0_12 = arith.constant 0 : index
    %c0_13 = arith.constant 0 : index
    %27 = vector.load %arg5[%c0_12, %c0_13] : memref<1x128xf32, #tpu.memory_space<vmem>>, vector<1x128xf32>
    %28 = vector.broadcast %27 : vector<1x128xf32> to vector<8x128xf32>
    %29 = arith.addf %26, %28 : vector<8x128xf32>
    %30 = arith.addf %0, %29 : vector<8x128xf32>
    %c0_14 = arith.constant 0 : index
    %c0_15 = arith.constant 0 : index
    %31 = vector.load %arg6[%c0_14, %c0_15] : memref<8x128xf32, #tpu.memory_space<vmem>>, vector<8x128xf32>
    tpu.vector_store %arg6[%c0_14, %c0_15], %30 {strides = array<i32>} : memref<8x128xf32, #tpu.memory_space<vmem>>, vector<8x128xf32>,
    return
  }
  func.func @transform_0(%arg0: i32) -> (i32, i32) {
    %c0_i32 = arith.constant 0 : i32
    %c0_i32_0 = arith.constant 0 : i32
    return %arg0, %c0_i32 : i32, i32
  }
  func.func @transform_1(%arg0: i32) -> (i32, i32) {
    %c0_i32 = arith.constant 0 : i32
    %c0_i32_0 = arith.constant 0 : i32
    %c0_i32_1 = arith.constant 0 : i32
    return %c0_i32, %c0_i32_0 : i32, i32
  }
  func.func @transform_2(%arg0: i32) -> (i32, i32) {
    %c0_i32 = arith.constant 0 : i32
    %c0_i32_0 = arith.constant 0 : i32
    %c0_i32_1 = arith.constant 0 : i32
    return %c0_i32, %c0_i32_0 : i32, i32
  }
  func.func @transform_3(%arg0: i32) -> (i32, i32) {
    %c0_i32 = arith.constant 0 : i32
    %c0_i32_0 = arith.constant 0 : i32
    %c0_i32_1 = arith.constant 0 : i32
    return %c0_i32, %c0_i32_0 : i32, i32
  }
  func.func @transform_4(%arg0: i32) -> (i32, i32) {
    %c0_i32 = arith.constant 0 : i32
    %c0_i32_0 = arith.constant 0 : i32
    %c0_i32_1 = arith.constant 0 : i32
    return %c0_i32, %c0_i32_0 : i32, i32
  }
  func.func @transform_5(%arg0: i32) -> (i32, i32) {
    %c0_i32 = arith.constant 0 : i32
    %c0_i32_0 = arith.constant 0 : i32
    return %arg0, %c0_i32 : i32, i32
  }
}

</mosaic_0001>

<bundles_post_ra>
// kernel: tpu_custom_call.1
= control target key start
LH: loop header
LB: loop body
LE: loop exit
PB: predicated region body
PF: predicated region fallthrough
CT: control target
= control target key end

     0   :  { %10 = vsyncpa [#allocation3], 0  ;;  %s1004_s0 = inlined_call_operand.hbm [shape: f32[16,128], index: 0, kind: input, shape index: {}]   ;;  %s1005_s1 = inlined_call_operand.hbm [shape: f32[1,128], index: 1, kind: input, shape index: {}]   ;;  %s1006_s2 = inlined_call_operand.vmem [shape: f32[1,128], index: 2, kind: input, shape index: {}]   ;;  %s1007_s3 = inlined_call_operand.hbm [shape: bf16[128,128], index: 3, kind: input, shape index: {}]   ;;  %s1008_s4 = inlined_call_operand.vmem [shape: f32[1,128], index: 4, kind: input, shape index: {}]   ;;  %s1009_s5 = inlined_call_operand.hbm [shape: f32[16,128], index: 5, kind: output, shape index: {}]  }
   0x1   :  { %12 = vsyncpa [#allocation3 + $0x1], 0 }
   0x2   :  { %13 = vsyncpa [#allocation6], 0 }
   0x3   :  { %14 = vsyncpa [#allocation4], 0 }
   0x4   :  { %16 = vsyncpa [#allocation4 + $0x1], 0  ;;  %s848_s18 = smov 0   ;;  %s850_s19 = smov 0  }
   0x5   :  { %s852_s20 = smov 0   ;;  %s854_s21 = smov 0  }
   0x6 LB: > { %s869_s22 = sadd.s32 4294967295, %s811_s21   ;;  %s516_s23 = sadd.s32 4294967294, %s811_s21   ;;  %s811_s21 = sphi %s854_s21, %s1019_s21   ;;  %s807_s20 = sphi %s852_s20, %s1018_s20   ;;  %s803_s19 = sphi %s850_s19, %s1017_s19   ;;  %s799_s18 = sphi %s848_s18, %s1016_s18  }
   0x7   : > { %p42_p0 = scmp.ne.s32.totalorder %s803_s19, %s799_s18  ;;  %p43_p1 = scmp.eq.s32.totalorder %s869_s22, 0 }
   0x8   : > { %p150_p2 = scmp.eq.s32.totalorder %s869_s22, 1  ;;  %p156_p3 = scmp.eq.s32.totalorder %s516_s23, 1 }
   0x9   : > { %p878_p4 = por %p43_p1, %p42_p0  ;;  %p517_p5 = scmp.ge.s32.totalorder %s811_s21, 1 }
   0xa   : > { %p883_p6 = por %p156_p3, %p42_p0  ;;  %p163_p7 = scmp.lt.s32.totalorder %s811_s21, 3 }
   0xb   : > { %s175_s28 = sshll.u32 %s1005_s1, 4  ;;  %s813_s30 = smov [#allocation5]   ;;  %s176_s28 = int_to_ptr.hbm [resolvable:$true] %s175_s28 }
   0xc   : > { %p891_p8 = pnand %p517_p5, %p163_p7  ;;  %s177_s6 = sshll.u32 %s813_s30, 4  ;;  %s178_s6 = int_to_ptr.vmem [resolvable:$true] %s177_s6 }
   0xd   : > { %s189_s9 = sshll.u32 %s1007_s3, 4  ;;  %s814_s10 = smov [#allocation7]   ;;  %s190_s9 = int_to_ptr.hbm [resolvable:$true] %s189_s9 }
   0xe   : > { %p584_p10 = pneg %p891_p8  ;;  %s191_s11 = sshll.u32 %s814_s10, 4  ;;  %s192_s11 = int_to_ptr.vmem [resolvable:$true] %s191_s11 }
   0xf   : > { %s815_s12 = smov 64   ;;  %s816_s13 = smov 4  }
  0x10   : > { %p585_p11 = pnand %p584_p10, %p43_p1  ;;  %s904_s14 = sadd.s32 1, %s811_s21  }
  0x11   : > { %s26_s15 = ssub.s32 %s811_s21, %s904_s14  ;;  %s29_s16 = sadd.s32 1, %s807_s20 }
  0x12   : > { %587 = dma.hbm_to_vmem [thread:$0]  (!%p585_p11), %s176_s28, 16, %s178_s6, [#allocation6]  }
  0x13   : > { %590 = dma.hbm_to_vmem [thread:$0]  (!%p585_p11), %s190_s9, 1024, %s192_s11, [#allocation6], %s815_s12, %s815_s12, %s816_s13  }
  0x14   : > { %p27_p12 = scmp.eq.s32.totalorder %s26_s15, 0  ;;  %p36_p13 = scmp.ne.s32.totalorder %s807_s20, %s803_s19 }
  0x15   : > { %p37_p0 = scmp.eq.s32.totalorder %s811_s21, 0  ;;  %p601_p7 = scmp.lt.s32.totalorder %s811_s21, 2 }
  0x16   : > { %s913_s17 = scalar_select %p27_p12, %s807_s20, %s29_s16  }
  0x17   : > { %p38_p3 = por %p37_p0, %p36_p13  ;;  %p917_p5 = por %p150_p2, %p36_p13 }
  0x18   : > { %s208_s26 = sand.u32 1, %s807_s20   ;;  %s522_s28 = sshll.u32 %s811_s21, 3 }
  0x19   : > { %s521_s27 = sshll.u32 %s208_s26, 3  ;;  %s216_s7 = scalar_lea.hbm %s1004_s0, %s522_s28 }
  0x1a   : > { %s212_s8 = scalar_lea.vmem [#allocation2], %s521_s27  ;;  %s218_s10 = sshll.u32 %s216_s7, 4  ;;  %s219_s10 = int_to_ptr.hbm [resolvable:$true] %s218_s10 }
  0x1b   : > { %s220_s9 = sshll.u32 %s212_s8, 4  ;;  %p927_p10 = pnand %p601_p7, %p38_p3  ;;  %s221_s9 = int_to_ptr.vmem [resolvable:$true] %s220_s9 }
  0x1c   : > { %s209_s12 = scalar_lea.sflag [#allocation3], %s208_s26  ;;  %s711_s13 = sshra.s32 %s219_s10, 4  ;;  %s712_s13 = int_to_ptr.hbm [resolvable:$true] %s711_s13 }
  0x1d   : > { %s713_s15 = scalar_lea.hbm %s712_s13, 8  ;;  %p715_p11 = pneg %p927_p10 }
  0x1e   : > { %p714_p2 = scmp.ne.s32.totalorder %s712_s13, %s713_s15  ;;  %s718_s28 = scalar_lea.hbm %s1004_s0, 16 }
  0x1f   : > { %p719_p0 = scmp.lt.s32.totalorder %s712_s13, %s1004_s0  ;;  %p720_p3 = scmp.lt.s32.totalorder %s718_s28, %s713_s15 }
  0x20   : > { %p716_p12 = pnand %p715_p11, %p714_p2 }
  0x21   : > { %p721_p7 = por %p720_p3, %p719_p0 }
  0x22   : > { %p717_p13 = pneg %p716_p12 }
  0x24   : > { %p722_p9 = pnand %p721_p7, %p717_p13 }
  0x26   : > { %725 = shalt.err (!%p722_p9)
}
  0x27   : > { %594 = dma.hbm_to_vmem [thread:$0]  (!%p927_p10), %s219_s10, 128, %s221_s9, %s209_s12  }
  0x28   : > { %229 = sbr.rel (%p891_p8) target bundleno = 471 (0x1d7), region = 40  ;;  %s944_s26 = sand.u32 (!%p891_p8), 1, %s803_s19  }
  0x29   : > { %s524_s7 = sshll.u32 (!%p891_p8), %s944_s26, 3  ;;  %s232_s8 = scalar_lea.sflag (!%p891_p8), [#allocation3], %s944_s26 }
  0x2a   : > { %s235_s13 = scalar_lea.vmem (!%p891_p8), [#allocation2], %s524_s7 }
  0x2d   : > { %786 = dma.done.wait (%p878_p4), %s232_s8, 128  }
  0x2e   : > { %788 = vsyncadd (%p878_p4), %s232_s8, 4294967168 }
  0x2f   : > { %790 = dma.done.wait (%p43_p1), [#allocation6], 1040  }
  0x30   : > { %792 = vsyncadd (%p43_p1), [#allocation6], 4294966256  ;;  %v958_v0 = vld [vmem:[%s235_s13] sm:$0xff]  ;;  %v817_v1 = vmov 128.0   ;;  %v568_v15 = vld [vmem:[#allocation7 + $0x20] sm:$0xff]  ;;  %s561_s9 = sshll.u32 %s869_s22, 3 }
  0x31   : > { %274 = vadd.xlane.f32.xlu0 %v958_v0  ;;  %645 = vrcp.f32 %v817_v1  ;;  %v571_v12 = vld [vmem:[#allocation7 + $0x38] sm:$0xff]  ;;  %v570_v13 = vld [vmem:[#allocation7 + $0x30] sm:$0xff]  ;;  %v569_v14 = vld [vmem:[#allocation7 + $0x28] sm:$0xff]  ;;  %s422_s16 = scalar_lea.hbm %s1009_s5, %s561_s9  ;;  %s272_s27 = scalar_lea.vmem [#allocation8], %s524_s7 }
  0x32   : > { %396 = vmatpush.bf16.msra.mxu0 %v571_v12  ;;  %v567_v17 = vld [vmem:[#allocation7 + $0x18] sm:$0xff]  ;;  %v566_v19 = vld [vmem:[#allocation7 + $0x10] sm:$0xff]  ;;  %v565_v20 = vld [vmem:[#allocation7 + $0x8] sm:$0xff]  ;;  %s424_s28 = sshll.u32 %s272_s27, 4  ;;  %s426_s30 = sshll.u32 %s422_s16, 4  ;;  %s425_s28 = int_to_ptr.vmem [resolvable:$true] %s424_s28  ;;  %s427_s30 = int_to_ptr.hbm [resolvable:$true] %s426_s30 }
  0x33   : > { %v564_v24 = vld [vmem:[#allocation7] sm:$0xff]  ;;  %v642_v42 = vld [vmem:[#allocation5] ss:$0 sm:$0xff]  ;;  %v643_v45 = vld [vmem:[%s1006_s2] ss:$0 sm:$0xff]  ;;  %s412_s22 = scalar_lea.sflag [#allocation4], %s944_s26 }
  0x34   : > { %v644_v49 = vld [vmem:[%s1008_s4] ss:$0 sm:$0xff]  ;;  %s755_s6 = sshra.s32 %s427_s30, 4  ;;  %s761_s7 = scalar_lea.hbm %s1009_s5, 16  ;;  %s756_s6 = int_to_ptr.hbm [resolvable:$true] %s755_s6 }
  0x35   : > { %s757_s8 = scalar_lea.hbm %s756_s6, 8  ;;  %p762_p9 = scmp.lt.s32.totalorder %s756_s6, %s1009_s5 }
  0x36   : > { %397 = vmatpush.bf16.msra.mxu0 %v570_v13  ;;  %p758_p1 = scmp.ne.s32.totalorder %s756_s6, %s757_s8  ;;  %p763_p10 = scmp.lt.s32.totalorder %s761_s7, %s757_s8 }
  0x37   : > { %v646_v2 = vpop.eup %645 }
  0x38   : > { %v277_v3 = vmul.f32 128.0, %v646_v2  ;;  %vm281_vm0 = vweird.f32 %v646_v2  ;;  %p759_p4 = pnand %p758_p1, %p917_p5  ;;  %p764_p2 = por %p763_p10, %p762_p9 }
  0x3a   : > { %v278_v4 = vsub.f32 1.0, %v277_v3  ;;  %398 = vmatpush.bf16.msra.mxu0 %v569_v14  ;;  %p760_p8 = pneg %p759_p4 }
  0x3c   : > { %v279_v5 = vmul.f32 %v646_v2, %v278_v4  ;;  %p765_p11 = pnand %p764_p2, %p760_p8 }
  0x3e   : > { %v280_v6 = vadd.f32 %v646_v2, %v279_v5  ;;  %399 = vmatpush.bf16.msra.mxu0 %v568_v15 }
  0x40   : > { %v282_v7 = vsel %vm281_vm0, %v646_v2, %v280_v6 }
  0x42   : > { %400 = vmatpush.bf16.msra.mxu0 %v567_v17 }
  0x46   : > { %401 = vmatpush.bf16.msra.mxu0 %v566_v19 }
  0x4a   : > { %402 = vmatpush.bf16.msra.mxu0 %v565_v20 }
  0x4e   : > { %403 = vmatpush.bf16.msra.mxu0 %v564_v24 }
  0xa4   : > { %v275_v8 = vpop.xlane.xlu0 %274 }
  0xa5   : > { %v283_v9 = vmul.f32 %v282_v7, %v275_v8 }
  0xa7   : > { %v284_v10 = vsub.f32 %v958_v0, %v283_v9 }
  0xa9   : > { %v285_v11 = vmul.f32 %v284_v10, %v284_v10 }
  0xab   : > { %286 = vadd.xlane.f32.xlu0 %v285_v11 }
 0x11e   : > { %v287_v16 = vpop.xlane.xlu0 %286 }
 0x11f   : > { %v288_v18 = vmul.f32 0.007874016, %v287_v16 }
 0x121   : > { %647 = vrsqrt.f32 %v288_v18  ;;  %vm296_vm1 = vcmp.eq.f32.partialorder %v288_v18, inf  ;;  %v299_v29 = vand.u32 2147483648, %v288_v18  ;;  %vm298_vm2 = vcmp.eq.f32.partialorder %v288_v18, 0.0 }
 0x127   : > { %v648_v21 = vpop.eup %647 }
 0x128   : > { %v290_v22 = vmul.f32 %v648_v21, %v288_v18 }
 0x12a   : > { %v291_v23 = vmul.f32 %v648_v21, %v290_v22 }
 0x12c   : > { %v292_v25 = vmul.f32 0.5, %v291_v23 }
 0x12e   : > { %v293_v26 = vsub.f32 1.5, %v292_v25 }
 0x130   : > { %v294_v27 = vmul.f32 %v648_v21, %v293_v26 }
 0x132   : > { %v295_v28 = vmul.f32 %v294_v27, %v288_v18 }
 0x134   : > { %v297_v30 = vsel %vm296_vm1, %v288_v18, %v295_v28 }
 0x135   : > { %v300_v31 = vsel %vm298_vm2, %v299_v29, %v297_v30 }
 0x136   : > { %v301_v32 = vadd.f32 1e-06, %v300_v31 }
 0x138   : > { %649 = vrcp.f32 %v301_v32  ;;  %v313_v36 = vand.u32 2147483648, %v301_v32  ;;  %v311_v38 = vand.u32 2147483647, %v301_v32  ;;  %vm307_vm4 = vweird.f32 %v301_v32 }
 0x13a   : > { %v314_v40 = vor.u32 1.1754944e-38, %v313_v36  ;;  %vm312_vm6 = vcmp.eq.f32.partialorder %v311_v38, 8.507059e+37 }
 0x13e   : > { %v650_v33 = vpop.eup %649 }
 0x13f   : > { %v303_v34 = vmul.f32 %v650_v33, %v301_v32  ;;  %vm308_vm3 = vweird.f32 %v650_v33 }
 0x140   : > { %vm309_vm5 = vmor %vm307_vm4, %vm308_vm3 }
 0x141   : > { %v304_v35 = vsub.f32 1.0, %v303_v34 }
 0x143   : > { %v305_v37 = vmul.f32 %v650_v33, %v304_v35 }
 0x145   : > { %v306_v39 = vadd.f32 %v650_v33, %v305_v37 }
 0x147   : > { %v310_v41 = vsel %vm309_vm5, %v650_v33, %v306_v39 }
 0x148   : > { %v315_v43 = vsel %vm312_vm6, %v314_v40, %v310_v41 }
 0x149   : > { %v317_v44 = vmul.f32 %v315_v43, %v284_v10 }
 0x14b   : > { %v321_v46 = vmul.f32 %v642_v42, %v317_v44 }
 0x14d   : > { %v326_v47 = vadd.f32 %v643_v45, %v321_v46 }
 0x14f   : > { %v327_v48 = vpack.c.bf16 %v326_v47, %v326_v47 }
 0x151   : > { %404 = vmatmul.bf16.vlgmr.msra.gmra.mxu0 %v327_v48 }
 0x1ce   : > { %v405_v50 = vpop.f32.mrf.mxu0 }
 0x1cf   : > { %v406_v51 = vadd.f32 %v644_v49, %v405_v50 }
 0x1d1   : > { %v409_v52 = vadd.f32 %v406_v51, %v958_v0 }
 0x1d3   : > { %410 = vst [vmem:[%s272_s27] sm:$0xff] %v409_v52 }
 0x1d4   : > { %768 = shalt.err (!%p765_p11)
}
 0x1d5   : > { %582 = dma.vmem_to_hbm [thread:$0]  (%p917_p5), %s425_s28, 128, %s427_s30, %s412_s22  }
 0x1d6   : > { %v407_v53 = vpop.f32.mrf.mxu0 }
 0x1d7 PF: > { %s438_s26 = sand.u32 1, %s799_s18   ;;  %p1015_p12 = scmp.ge.s32.totalorder %s811_s21, 2 }
 0x1d8   : > { %s439_s10 = scalar_lea.sflag [#allocation4], %s438_s26 }
 0x1d9   : > { %p596_p13 = pnand %p1015_p12, %p883_p6 }
 0x1db   : > { %p597_p0 = pneg %p596_p13 }
 0x1dd   : > { %794 = dma.done.wait (%p597_p0), %s439_s10, 128  }
 0x1de   : > { %796 = vsyncadd (%p597_p0), %s439_s10, 4294967168  ;;  %p19_p3 = scmp.ge.s32.totalorder %s904_s14, 4   ;;  %s1016_s18 = smov %s803_s19 }
 0x1df   : > { %s1017_s19 = smov %s807_s20  ;;  %s1018_s20 = smov %s913_s17 }
 0x1e0   : > { %s1019_s21 = smov %s904_s14  ;;  %21 = sbr.rel (!%p19_p3) target bundleno = 6 (0x6), region = 93 }
 0x1e5   :  { %445 = vsyncpa [#allocation3], 1 }
 0x1e6   :  { %447 = vsyncpa [#allocation3 + $0x1], 1 }
 0x1e7   :  { %448 = vsyncpa [#allocation6], 1 }
 0x1e8   :  { %449 = vsyncpa [#allocation4], 1 }
 0x1e9   :  { %451 = vsyncpa [#allocation4 + $0x1], 1 }

// kernel: tpu_custom_call.1
= control target key start
LH: loop header
LB: loop body
LE: loop exit
PB: predicated region body
PF: predicated region fallthrough
CT: control target
= control target key end

     0   :  { %10 = vsyncpa [#allocation3], 0  ;;  %s1004_s0 = inlined_call_operand.hbm [shape: f32[16,128], index: 0, kind: input, shape index: {}]   ;;  %s1005_s1 = inlined_call_operand.hbm [shape: f32[1,128], index: 1, kind: input, shape index: {}]   ;;  %s1006_s2 = inlined_call_operand.vmem [shape: f32[1,128], index: 2, kind: input, shape index: {}]   ;;  %s1007_s3 = inlined_call_operand.hbm [shape: bf16[128,128], index: 3, kind: input, shape index: {}]   ;;  %s1008_s4 = inlined_call_operand.vmem [shape: f32[1,128], index: 4, kind: input, shape index: {}]   ;;  %s1009_s5 = inlined_call_operand.hbm [shape: f32[16,128], index: 5, kind: output, shape index: {}]  }
   0x1   :  { %12 = vsyncpa [#allocation3 + $0x1], 0 }
   0x2   :  { %13 = vsyncpa [#allocation6], 0 }
   0x3   :  { %14 = vsyncpa [#allocation4], 0 }
   0x4   :  { %16 = vsyncpa [#allocation4 + $0x1], 0  ;;  %s848_s18 = smov 0   ;;  %s850_s19 = smov 0  }
   0x5   :  { %s852_s20 = smov 0   ;;  %s854_s21 = smov 0  }
   0x6 LB: > { %s869_s22 = sadd.s32 4294967295, %s811_s21   ;;  %s516_s23 = sadd.s32 4294967294, %s811_s21   ;;  %s811_s21 = sphi %s854_s21, %s1019_s21   ;;  %s807_s20 = sphi %s852_s20, %s1018_s20   ;;  %s803_s19 = sphi %s850_s19, %s1017_s19   ;;  %s799_s18 = sphi %s848_s18, %s1016_s18  }
   0x7   : > { %p42_p0 = scmp.ne.s32.totalorder %s803_s19, %s799_s18  ;;  %p43_p1 = scmp.eq.s32.totalorder %s869_s22, 0 }
   0x8   : > { %p150_p2 = scmp.eq.s32.totalorder %s869_s22, 1  ;;  %p156_p3 = scmp.eq.s32.totalorder %s516_s23, 1 }
   0x9   : > { %p878_p4 = por %p43_p1, %p42_p0  ;;  %p517_p5 = scmp.ge.s32.totalorder %s811_s21, 1 }
   0xa   : > { %p883_p6 = por %p156_p3, %p42_p0  ;;  %p163_p7 = scmp.lt.s32.totalorder %s811_s21, 3 }
   0xb   : > { %s175_s28 = sshll.u32 %s1005_s1, 4  ;;  %s813_s30 = smov [#allocation5]   ;;  %s176_s28 = int_to_ptr.hbm [resolvable:$true] %s175_s28 }
   0xc   : > { %p891_p8 = pnand %p517_p5, %p163_p7  ;;  %s177_s6 = sshll.u32 %s813_s30, 4  ;;  %s178_s6 = int_to_ptr.vmem [resolvable:$true] %s177_s6 }
   0xd   : > { %s189_s9 = sshll.u32 %s1007_s3, 4  ;;  %s814_s10 = smov [#allocation7]   ;;  %s190_s9 = int_to_ptr.hbm [resolvable:$true] %s189_s9 }
   0xe   : > { %p584_p10 = pneg %p891_p8  ;;  %s191_s11 = sshll.u32 %s814_s10, 4  ;;  %s192_s11 = int_to_ptr.vmem [resolvable:$true] %s191_s11 }
   0xf   : > { %s815_s12 = smov 64   ;;  %s816_s13 = smov 4  }
  0x10   : > { %p585_p11 = pnand %p584_p10, %p43_p1  ;;  %s904_s14 = sadd.s32 1, %s811_s21  }
  0x11   : > { %s26_s15 = ssub.s32 %s811_s21, %s904_s14  ;;  %s29_s16 = sadd.s32 1, %s807_s20 }
  0x12   : > { %587 = dma.hbm_to_vmem [thread:$0]  (!%p585_p11), %s176_s28, 16, %s178_s6, [#allocation6]  }
  0x13   : > { %590 = dma.hbm_to_vmem [thread:$0]  (!%p585_p11), %s190_s9, 1024, %s192_s11, [#allocation6], %s815_s12, %s815_s12, %s816_s13  }
  0x14   : > { %p27_p12 = scmp.eq.s32.totalorder %s26_s15, 0  ;;  %p36_p13 = scmp.ne.s32.totalorder %s807_s20, %s803_s19 }
  0x15   : > { %p37_p0 = scmp.eq.s32.totalorder %s811_s21, 0  ;;  %p601_p7 = scmp.lt.s32.totalorder %s811_s21, 2 }
  0x16   : > { %s913_s17 = scalar_select %p27_p12, %s807_s20, %s29_s16  }
  0x17   : > { %p38_p3 = por %p37_p0, %p36_p13  ;;  %p917_p5 = por %p150_p2, %p36_p13 }
  0x18   : > { %s208_s26 = sand.u32 1, %s807_s20   ;;  %s522_s28 = sshll.u32 %s811_s21, 3 }
  0x19   : > { %s521_s27 = sshll.u32 %s208_s26, 3  ;;  %s216_s7 = scalar_lea.hbm %s1004_s0, %s522_s28 }
  0x1a   : > { %s212_s8 = scalar_lea.vmem [#allocation2], %s521_s27  ;;  %s218_s10 = sshll.u32 %s216_s7, 4  ;;  %s219_s10 = int_to_ptr.hbm [resolvable:$true] %s218_s10 }
  0x1b   : > { %s220_s9 = sshll.u32 %s212_s8, 4  ;;  %p927_p10 = pnand %p601_p7, %p38_p3  ;;  %s221_s9 = int_to_ptr.vmem [resolvable:$true] %s220_s9 }
  0x1c   : > { %s209_s12 = scalar_lea.sflag [#allocation3], %s208_s26  ;;  %s711_s13 = sshra.s32 %s219_s10, 4  ;;  %s712_s13 = int_to_ptr.hbm [resolvable:$true] %s711_s13 }
  0x1d   : > { %s713_s15 = scalar_lea.hbm %s712_s13, 8  ;;  %p715_p11 = pneg %p927_p10 }
  0x1e   : > { %p714_p2 = scmp.ne.s32.totalorder %s712_s13, %s713_s15  ;;  %s718_s28 = scalar_lea.hbm %s1004_s0, 16 }
  0x1f   : > { %p719_p0 = scmp.lt.s32.totalorder %s712_s13, %s1004_s0  ;;  %p720_p3 = scmp.lt.s32.totalorder %s718_s28, %s713_s15 }
  0x20   : > { %p716_p12 = pnand %p715_p11, %p714_p2 }
  0x21   : > { %p721_p7 = por %p720_p3, %p719_p0 }
  0x22   : > { %p717_p13 = pneg %p716_p12 }
  0x24   : > { %p722_p9 = pnand %p721_p7, %p717_p13 }
  0x26   : > { %725 = shalt.err (!%p722_p9)
}
  0x27   : > { %594 = dma.hbm_to_vmem [thread:$0]  (!%p927_p10), %s219_s10, 128, %s221_s9, %s209_s12  }
  0x28   : > { %229 = sbr.rel (%p891_p8) target bundleno = 471 (0x1d7), region = 40  ;;  %s944_s26 = sand.u32 (!%p891_p8), 1, %s803_s19  }
  0x29   : > { %s524_s7 = sshll.u32 (!%p891_p8), %s944_s26, 3  ;;  %s232_s8 = scalar_lea.sflag (!%p891_p8), [#allocation3], %s944_s26 }
  0x2a   : > { %s235_s13 = scalar_lea.vmem (!%p891_p8), [#allocation2], %s524_s7 }
  0x2d   : > { %786 = dma.done.wait (%p878_p4), %s232_s8, 128  }
  0x2e   : > { %788 = vsyncadd (%p878_p4), %s232_s8, 4294967168 }
  0x2f   : > { %790 = dma.done.wait (%p43_p1), [#allocation6], 1040  }
  0x30   : > { %792 = vsyncadd (%p43_p1), [#allocation6], 4294966256  ;;  %v958_v0 = vld [vmem:[%s235_s13] sm:$0xff]  ;;  %v817_v1 = vmov 128.0   ;;  %v568_v15 = vld [vmem:[#allocation7 + $0x20] sm:$0xff]  ;;  %s561_s9 = sshll.u32 %s869_s22, 3 }
  0x31   : > { %274 = vadd.xlane.f32.xlu0 %v958_v0  ;;  %645 = vrcp.f32 %v817_v1  ;;  %v571_v12 = vld [vmem:[#allocation7 + $0x38] sm:$0xff]  ;;  %v570_v13 = vld [vmem:[#allocation7 + $0x30] sm:$0xff]  ;;  %v569_v14 = vld [vmem:[#allocation7 + $0x28] sm:$0xff]  ;;  %s422_s16 = scalar_lea.hbm %s1009_s5, %s561_s9  ;;  %s272_s27 = scalar_lea.vmem [#allocation8], %s524_s7 }
  0x32   : > { %396 = vmatpush.bf16.msra.mxu0 %v571_v12  ;;  %v567_v17 = vld [vmem:[#allocation7 + $0x18] sm:$0xff]  ;;  %v566_v19 = vld [vmem:[#allocation7 + $0x10] sm:$0xff]  ;;  %v565_v20 = vld [vmem:[#allocation7 + $0x8] sm:$0xff]  ;;  %s424_s28 = sshll.u32 %s272_s27, 4  ;;  %s426_s30 = sshll.u32 %s422_s16, 4  ;;  %s425_s28 = int_to_ptr.vmem [resolvable:$true] %s424_s28  ;;  %s427_s30 = int_to_ptr.hbm [resolvable:$true] %s426_s30 }
  0x33   : > { %v564_v24 = vld [vmem:[#allocation7] sm:$0xff]  ;;  %v642_v42 = vld [vmem:[#allocation5] ss:$0 sm:$0xff]  ;;  %v643_v45 = vld [vmem:[%s1006_s2] ss:$0 sm:$0xff]  ;;  %s412_s22 = scalar_lea.sflag [#allocation4], %s944_s26 }
  0x34   : > { %v644_v49 = vld [vmem:[%s1008_s4] ss:$0 sm:$0xff]  ;;  %s755_s6 = sshra.s32 %s427_s30, 4  ;;  %s761_s7 = scalar_lea.hbm %s1009_s5, 16  ;;  %s756_s6 = int_to_ptr.hbm [resolvable:$true] %s755_s6 }
  0x35   : > { %s757_s8 = scalar_lea.hbm %s756_s6, 8  ;;  %p762_p9 = scmp.lt.s32.totalorder %s756_s6, %s1009_s5 }
  0x36   : > { %397 = vmatpush.bf16.msra.mxu0 %v570_v13  ;;  %p758_p1 = scmp.ne.s32.totalorder %s756_s6, %s757_s8  ;;  %p763_p10 = scmp.lt.s32.totalorder %s761_s7, %s757_s8 }
  0x37   : > { %v646_v2 = vpop.eup %645 }
  0x38   : > { %v277_v3 = vmul.f32 128.0, %v646_v2  ;;  %vm281_vm0 = vweird.f32 %v646_v2  ;;  %p759_p4 = pnand %p758_p1, %p917_p5  ;;  %p764_p2 = por %p763_p10, %p762_p9 }
  0x3a   : > { %v278_v4 = vsub.f32 1.0, %v277_v3  ;;  %398 = vmatpush.bf16.msra.mxu0 %v569_v14  ;;  %p760_p8 = pneg %p759_p4 }
  0x3c   : > { %v279_v5 = vmul.f32 %v646_v2, %v278_v4  ;;  %p765_p11 = pnand %p764_p2, %p760_p8 }
  0x3e   : > { %v280_v6 = vadd.f32 %v646_v2, %v279_v5  ;;  %399 = vmatpush.bf16.msra.mxu0 %v568_v15 }
  0x40   : > { %v282_v7 = vsel %vm281_vm0, %v646_v2, %v280_v6 }
  0x42   : > { %400 = vmatpush.bf16.msra.mxu0 %v567_v17 }
  0x46   : > { %401 = vmatpush.bf16.msra.mxu0 %v566_v19 }
  0x4a   : > { %402 = vmatpush.bf16.msra.mxu0 %v565_v20 }
  0x4e   : > { %403 = vmatpush.bf16.msra.mxu0 %v564_v24 }
  0xa4   : > { %v275_v8 = vpop.xlane.xlu0 %274 }
  0xa5   : > { %v283_v9 = vmul.f32 %v282_v7, %v275_v8 }
  0xa7   : > { %v284_v10 = vsub.f32 %v958_v0, %v283_v9 }
  0xa9   : > { %v285_v11 = vmul.f32 %v284_v10, %v284_v10 }
  0xab   : > { %286 = vadd.xlane.f32.xlu0 %v285_v11 }
 0x11e   : > { %v287_v16 = vpop.xlane.xlu0 %286 }
 0x11f   : > { %v288_v18 = vmul.f32 0.007874016, %v287_v16 }
 0x121   : > { %647 = vrsqrt.f32 %v288_v18  ;;  %vm296_vm1 = vcmp.eq.f32.partialorder %v288_v18, inf  ;;  %v299_v29 = vand.u32 2147483648, %v288_v18  ;;  %vm298_vm2 = vcmp.eq.f32.partialorder %v288_v18, 0.0 }
 0x127   : > { %v648_v21 = vpop.eup %647 }
 0x128   : > { %v290_v22 = vmul.f32 %v648_v21, %v288_v18 }
 0x12a   : > { %v291_v23 = vmul.f32 %v648_v21, %v290_v22 }
 0x12c   : > { %v292_v25 = vmul.f32 0.5, %v291_v23 }
 0x12e   : > { %v293_v26 = vsub.f32 1.5, %v292_v25 }
 0x130   : > { %v294_v27 = vmul.f32 %v648_v21, %v293_v26 }
 0x132   : > { %v295_v28 = vmul.f32 %v294_v27, %v288_v18 }
 0x134   : > { %v297_v30 = vsel %vm296_vm1, %v288_v18, %v295_v28 }
 0x135   : > { %v300_v31 = vsel %vm298_vm2, %v299_v29, %v297_v30 }
 0x136   : > { %v301_v32 = vadd.f32 1e-06, %v300_v31 }
 0x138   : > { %649 = vrcp.f32 %v301_v32  ;;  %v313_v36 = vand.u32 2147483648, %v301_v32  ;;  %v311_v38 = vand.u32 2147483647, %v301_v32  ;;  %vm307_vm4 = vweird.f32 %v301_v32 }
 0x13a   : > { %v314_v40 = vor.u32 1.1754944e-38, %v313_v36  ;;  %vm312_vm6 = vcmp.eq.f32.partialorder %v311_v38, 8.507059e+37 }
 0x13e   : > { %v650_v33 = vpop.eup %649 }
 0x13f   : > { %v303_v34 = vmul.f32 %v650_v33, %v301_v32  ;;  %vm308_vm3 = vweird.f32 %v650_v33 }
 0x140   : > { %vm309_vm5 = vmor %vm307_vm4, %vm308_vm3 }
 0x141   : > { %v304_v35 = vsub.f32 1.0, %v303_v34 }
 0x143   : > { %v305_v37 = vmul.f32 %v650_v33, %v304_v35 }
 0x145   : > { %v306_v39 = vadd.f32 %v650_v33, %v305_v37 }
 0x147   : > { %v310_v41 = vsel %vm309_vm5, %v650_v33, %v306_v39 }
 0x148   : > { %v315_v43 = vsel %vm312_vm6, %v314_v40, %v310_v41 }
 0x149   : > { %v317_v44 = vmul.f32 %v315_v43, %v284_v10 }
 0x14b   : > { %v321_v46 = vmul.f32 %v642_v42, %v317_v44 }
 0x14d   : > { %v326_v47 = vadd.f32 %v643_v45, %v321_v46 }
 0x14f   : > { %v327_v48 = vpack.c.bf16 %v326_v47, %v326_v47 }
 0x151   : > { %404 = vmatmul.bf16.vlgmr.msra.gmra.mxu0 %v327_v48 }
 0x1ce   : > { %v405_v50 = vpop.f32.mrf.mxu0 }
 0x1cf   : > { %v406_v51 = vadd.f32 %v644_v49, %v405_v50 }
 0x1d1   : > { %v409_v52 = vadd.f32 %v406_v51, %v958_v0 }
 0x1d3   : > { %410 = vst [vmem:[%s272_s27] sm:$0xff] %v409_v52 }
 0x1d4   : > { %768 = shalt.err (!%p765_p11)
}
 0x1d5   : > { %582 = dma.vmem_to_hbm [thread:$0]  (%p917_p5), %s425_s28, 128, %s427_s30, %s412_s22  }
 0x1d6   : > { %v407_v53 = vpop.f32.mrf.mxu0 }
 0x1d7 PF: > { %s438_s26 = sand.u32 1, %s799_s18   ;;  %p1015_p12 = scmp.ge.s32.totalorder %s811_s21, 2 }
 0x1d8   : > { %s439_s10 = scalar_lea.sflag [#allocation4], %s438_s26 }
 0x1d9   : > { %p596_p13 = pnand %p1015_p12, %p883_p6 }
 0x1db   : > { %p597_p0 = pneg %p596_p13 }
 0x1dd   : > { %794 = dma.done.wait (%p597_p0), %s439_s10, 128  }
 0x1de   : > { %796 = vsyncadd (%p597_p0), %s439_s10, 4294967168  ;;  %p19_p3 = scmp.ge.s32.totalorder %s904_s14, 4   ;;  %s1016_s18 = smov %s803_s19 }
 0x1df   : > { %s1017_s19 = smov %s807_s20  ;;  %s1018_s20 = smov %s913_s17 }
 0x1e0   : > { %s1019_s21 = smov %s904_s14  ;;  %21 = sbr.rel (!%p19_p3) target bundleno = 6 (0x6), region = 93 }
 0x1e5   :  { %445 = vsyncpa [#allocation3], 1 }
 0x1e6   :  { %447 = vsyncpa [#allocation3 + $0x1], 1 }
 0x1e7   :  { %448 = vsyncpa [#allocation6], 1 }
 0x1e8   :  { %449 = vsyncpa [#allocation4], 1 }
 0x1e9   :  { %451 = vsyncpa [#allocation4 + $0x1], 1 }

</bundles_post_ra>
